<compile_context>
chip_gen: v7x
topology: tpu7x:2x2x1
jax: 0.10.0
libtpu: 0.0.40
codegen_flags: <defaults>
</compile_context>

<pallas_src>
import jax
import jax.numpy as jnp
from jax.experimental import pallas as pl
from jax.experimental.pallas import tpu as pltpu

LANE = 128


def _round_up(n, m):
    return ((n + m - 1) // m) * m


def mlp_kernel(x_ref, w1_ref, b1_ref, w2_ref, b2_ref, o_ref):
    """relu(x @ W1 + b1) @ W2 + b2 for one (tm, latent_dim) batch tile.

    Layer 1 (tiny K) runs on the VPU as K unrolled broadcast-MACs; layer 2 is a
    single lane-dense 128x128 MXU matmul on zero-padded weights.  The padded
    result columns are sliced off before the (tm, num_class) store, so only
    num_class lanes ever hit HBM.
    """
    x = x_ref[...]                                  # (tm, K) f32
    w1 = w1_ref[...]                                # (K, Hp) f32
    tm = x.shape[0]
    k_dim = x.shape[1]
    num_class = o_ref.shape[1]

    # Layer 1: h = b1 + sum_k x[:, k] * w1[k, :]   (VPU, no MXU fill for K=4)
    h = jnp.broadcast_to(b1_ref[...], (tm, w1.shape[1]))
    for k in range(k_dim):                          # static unroll, K is tiny
        h = h + x[:, k:k + 1] * w1[k:k + 1, :]
    h = jnp.maximum(h, 0.0)                         # ReLU on the VPU

    # Layer 2: lane-dense 128x128 MXU matmul + bias, then drop padded lanes.
    y = jnp.dot(h, w2_ref[...], preferred_element_type=jnp.float32)
    y = y + b2_ref[...]
    o_ref[...] = y[:, :num_class].astype(o_ref.dtype)


def mlp_forward(x, w1, b1, w2, b2, *, tm=2048):
    """x: (B, latent_dim) f32; w1: (latent_dim, hidden); b1: (hidden,);
    w2: (hidden, num_class); b2: (num_class,)  ->  (B, num_class) f32."""
    batch, latent_dim = x.shape
    hidden_dim = w1.shape[1]
    num_class = w2.shape[1]

    hidden_p = _round_up(hidden_dim, LANE)          # 48  -> 128
    class_p = _round_up(num_class, LANE)            # 10  -> 128 (weights only)

    # ---- wrapper-side layout plumbing: zero-padded, lane-dense weights ----
    w1p = jnp.zeros((latent_dim, hidden_p), jnp.float32).at[:, :hidden_dim].set(w1)
    b1p = jnp.zeros((1, hidden_p), jnp.float32).at[:, :hidden_dim].set(
        b1.reshape(1, -1))
    w2p = jnp.zeros((hidden_p, class_p), jnp.float32).at[:hidden_dim, :num_class].set(w2)
    b2p = jnp.zeros((1, class_p), jnp.float32).at[:, :num_class].set(
        b2.reshape(1, -1))

    # ---- batch tiling: weights stay VMEM-resident, x / out stream by tile ----
    tm = max(8, min(tm, _round_up(batch, 8)))
    if (batch + tm - 1) // tm == 1 and batch >= 16:
        # Keep >= 2 grid steps so both v7x TensorCores get work.
        tm = _round_up((batch + 1) // 2, 8)
    batch_p = _round_up(batch, tm)
    if batch_p == batch:
        xp = x                                       # no wrapper pad copy
    else:
        xp = jnp.zeros((batch_p, latent_dim), x.dtype).at[:batch].set(x)
    grid = (batch_p // tm,)

    # Scoped-VMEM budget: x + out double-buffered (lane-padded to 128 in VMEM)
    # plus the h intermediate ~ 5 * 512 B/row, plus resident weights + margin.
    per_row = 4 * 5 * LANE
    vmem_need = per_row * tm + (1 << 20)
    vmem_limit = int(min(64 << 20, max(16 << 20, 2 * vmem_need)))

    flops = 2 * batch_p * (latent_dim * hidden_p + hidden_p * class_p)
    bytes_accessed = 4 * (xp.size + w1p.size + b1p.size + w2p.size + b2p.size
                          + batch_p * num_class)

    out = pl.pallas_call(
        mlp_kernel,
        out_shape=jax.ShapeDtypeStruct((batch_p, num_class), jnp.float32),
        grid=grid,
        in_specs=[
            pl.BlockSpec((tm, latent_dim), lambda i: (i, 0)),        # x tile
            pl.BlockSpec((latent_dim, hidden_p), lambda i: (0, 0)),  # W1 (resident)
            pl.BlockSpec((1, hidden_p), lambda i: (0, 0)),           # b1 (resident)
            pl.BlockSpec((hidden_p, class_p), lambda i: (0, 0)),     # W2 (resident)
            pl.BlockSpec((1, class_p), lambda i: (0, 0)),            # b2 (resident)
        ],
        out_specs=pl.BlockSpec((tm, num_class), lambda i: (i, 0)),   # unpadded
        compiler_params=pltpu.CompilerParams(
            dimension_semantics=("parallel",),
            vmem_limit_bytes=vmem_limit,
        ),
        cost_estimate=pl.CostEstimate(
            flops=flops, transcendentals=0, bytes_accessed=bytes_accessed),
    )(xp, w1p, b1p, w2p, b2p)

    if batch_p == batch:
        return out                                   # no wrapper slice copy
    return out[:batch]


def init_params(key, latent_dim=4, hidden_dim=48, num_class=10):
    """nn.Linear-style init U(-1/sqrt(fan_in), 1/sqrt(fan_in)).

    Weights are stored as (in_features, out_features) so the forward uses x @ W
    (transposed relative to nn.Linear's weight storage, same math).
    """
    k1, k2, k3, k4 = jax.random.split(key, 4)
    bound1 = 1.0 / jnp.sqrt(latent_dim)
    bound2 = 1.0 / jnp.sqrt(hidden_dim)
    w1 = jax.random.uniform(k1, (latent_dim, hidden_dim), jnp.float32, -bound1, bound1)
    b1 = jax.random.uniform(k2, (hidden_dim,), jnp.float32, -bound1, bound1)
    w2 = jax.random.uniform(k3, (hidden_dim, num_class), jnp.float32, -bound2, bound2)
    b2 = jax.random.uniform(k4, (num_class,), jnp.float32, -bound2, bound2)
    return w1, b1, w2, b2


if __name__ == "__main__":
    key = jax.random.PRNGKey(0)
    kx, kp = jax.random.split(key)

    batch, latent_dim, hidden_dim, num_class = 8, 4, 48, 10
    x = jax.random.normal(kx, (batch, latent_dim), jnp.float32)
    w1, b1, w2, b2 = init_params(kp, latent_dim, hidden_dim, num_class)

    out = mlp_forward(x, w1, b1, w2, b2)
    out = jax.block_until_ready(out)

    # Pure-JAX reference check.
    ref = jnp.maximum(x @ w1 + b1, 0.0) @ w2 + b2
    assert out.shape == (batch, num_class)
    assert jnp.allclose(out, ref, atol=1e-5, rtol=1e-5)

    print("KERNEL_OK")
</pallas_src>

<mosaic_0001>
module attributes {stable_mosaic.version = 11 : i64} {
  func.func @mlp_kernel(%arg0: i32, %arg1: memref<8x4xf32, #tpu.memory_space<vmem>>, %arg2: memref<4x128xf32, #tpu.memory_space<vmem>>, %arg3: memref<1x128xf32, #tpu.memory_space<vmem>>, %arg4: memref<128x128xf32, #tpu.memory_space<vmem>>, %arg5: memref<1x128xf32, #tpu.memory_space<vmem>>, %arg6: memref<8x10xf32, #tpu.memory_space<vmem>>) attributes {dimension_semantics = [#tpu.dimension_semantics<parallel>], iteration_bounds = array<i64: 1>, scalar_prefetch = 0 : i64, scratch_operands = 0 : i64, tpu.core_type = #tpu.core_type<tc>, window_params = [{transform_indices = @transform_0, window_bounds = array<i64: 8, 4>}, {pipeline_mode = #tpu.pipeline_mode<synchronous>, transform_indices = @transform_1, window_bounds = array<i64: 4, 128>}, {pipeline_mode = #tpu.pipeline_mode<synchronous>, transform_indices = @transform_2, window_bounds = array<i64: 1, 128>}, {pipeline_mode = #tpu.pipeline_mode<synchronous>, transform_indices = @transform_3, window_bounds = array<i64: 128, 128>}, {pipeline_mode = #tpu.pipeline_mode<synchronous>, transform_indices = @transform_4, window_bounds = array<i64: 1, 128>}, {transform_indices = @transform_5, window_bounds = array<i64: 8, 10>}]} {
    %c0 = arith.constant 0 : index
    %c0_0 = arith.constant 0 : index
    %0 = vector.load %arg1[%c0, %c0_0] : memref<8x4xf32, #tpu.memory_space<vmem>>, vector<8x4xf32>
    %c0_1 = arith.constant 0 : index
    %c0_2 = arith.constant 0 : index
    %1 = vector.load %arg2[%c0_1, %c0_2] : memref<4x128xf32, #tpu.memory_space<vmem>>, vector<4x128xf32>
    %c0_3 = arith.constant 0 : index
    %c0_4 = arith.constant 0 : index
    %2 = vector.load %arg3[%c0_3, %c0_4] : memref<1x128xf32, #tpu.memory_space<vmem>>, vector<1x128xf32>
    %3 = vector.shape_cast %2 : vector<1x128xf32> to vector<1x128xf32>
    %4 = vector.broadcast %3 : vector<1x128xf32> to vector<8x128xf32>
    %5 = vector.extract_strided_slice %0 {offsets = [0, 0], sizes = [8, 1], strides = [1, 1]} : vector<8x4xf32> to vector<8x1xf32>
    %6 = vector.extract_strided_slice %1 {offsets = [0, 0], sizes = [1, 128], strides = [1, 1]} : vector<4x128xf32> to vector<1x128xf32>
    %7 = vector.broadcast %5 : vector<8x1xf32> to vector<8x128xf32>
    %8 = vector.broadcast %6 : vector<1x128xf32> to vector<8x128xf32>
    %9 = arith.mulf %7, %8 : vector<8x128xf32>
    %10 = arith.addf %4, %9 : vector<8x128xf32>
    %11 = vector.extract_strided_slice %0 {offsets = [0, 1], sizes = [8, 1], strides = [1, 1]} : vector<8x4xf32> to vector<8x1xf32>
    %12 = vector.extract_strided_slice %1 {offsets = [1, 0], sizes = [1, 128], strides = [1, 1]} : vector<4x128xf32> to vector<1x128xf32>
    %13 = vector.broadcast %11 : vector<8x1xf32> to vector<8x128xf32>
    %14 = vector.broadcast %12 : vector<1x128xf32> to vector<8x128xf32>
    %15 = arith.mulf %13, %14 : vector<8x128xf32>
    %16 = arith.addf %10, %15 : vector<8x128xf32>
    %17 = vector.extract_strided_slice %0 {offsets = [0, 2], sizes = [8, 1], strides = [1, 1]} : vector<8x4xf32> to vector<8x1xf32>
    %18 = vector.extract_strided_slice %1 {offsets = [2, 0], sizes = [1, 128], strides = [1, 1]} : vector<4x128xf32> to vector<1x128xf32>
    %19 = vector.broadcast %17 : vector<8x1xf32> to vector<8x128xf32>
    %20 = vector.broadcast %18 : vector<1x128xf32> to vector<8x128xf32>
    %21 = arith.mulf %19, %20 : vector<8x128xf32>
    %22 = arith.addf %16, %21 : vector<8x128xf32>
    %23 = vector.extract_strided_slice %0 {offsets = [0, 3], sizes = [8, 1], strides = [1, 1]} : vector<8x4xf32> to vector<8x1xf32>
    %24 = vector.extract_strided_slice %1 {offsets = [3, 0], sizes = [1, 128], strides = [1, 1]} : vector<4x128xf32> to vector<1x128xf32>
    %25 = vector.broadcast %23 : vector<8x1xf32> to vector<8x128xf32>
    %26 = vector.broadcast %24 : vector<1x128xf32> to vector<8x128xf32>
    %27 = arith.mulf %25, %26 : vector<8x128xf32>
    %28 = arith.addf %22, %27 : vector<8x128xf32>
    %cst = arith.constant 0.000000e+00 : f32
    %29 = vector.broadcast %cst : f32 to vector<8x128xf32>
    %30 = arith.maximumf %28, %29 : vector<8x128xf32>
    %c0_5 = arith.constant 0 : index
    %c0_6 = arith.constant 0 : index
    %31 = vector.load %arg4[%c0_5, %c0_6] : memref<128x128xf32, #tpu.memory_space<vmem>>, vector<128x128xf32>
    %cst_7 = arith.constant dense<0.000000e+00> : vector<8x128xf32>
    %32 = tpu.matmul %30, %31, %cst_7 {dimension_numbers = #tpu.dot_dimension_numbers<[1], [0], [0], [1], [0, 0, 1, 1], [], []>} : vector<8x128xf32>, vector<128x128xf32>, vector<8x128xf32> -> vector<8x128xf32>
    %c0_8 = arith.constant 0 : index
    %c0_9 = arith.constant 0 : index
    %33 = vector.load %arg5[%c0_8, %c0_9] : memref<1x128xf32, #tpu.memory_space<vmem>>, vector<1x128xf32>
    %34 = vector.broadcast %33 : vector<1x128xf32> to vector<8x128xf32>
    %35 = arith.addf %32, %34 : vector<8x128xf32>
    %36 = vector.extract_strided_slice %35 {offsets = [0, 0], sizes = [8, 10], strides = [1, 1]} : vector<8x128xf32> to vector<8x10xf32>
    %c0_10 = arith.constant 0 : index
    %c0_11 = arith.constant 0 : index
    %37 = vector.load %arg6[%c0_10, %c0_11] : memref<8x10xf32, #tpu.memory_space<vmem>>, vector<8x10xf32>
    tpu.vector_store %arg6[%c0_10, %c0_11], %36 {strides = array<i32>} : memref<8x10xf32, #tpu.memory_space<vmem>>, vector<8x10xf32>,
    return
  }
  func.func @transform_0(%arg0: i32) -> (i32, i32) {
    %c0_i32 = arith.constant 0 : i32
    %c0_i32_0 = arith.constant 0 : i32
    return %arg0, %c0_i32 : i32, i32
  }
  func.func @transform_1(%arg0: i32) -> (i32, i32) {
    %c0_i32 = arith.constant 0 : i32
    %c0_i32_0 = arith.constant 0 : i32
    %c0_i32_1 = arith.constant 0 : i32
    return %c0_i32, %c0_i32_0 : i32, i32
  }
  func.func @transform_2(%arg0: i32) -> (i32, i32) {
    %c0_i32 = arith.constant 0 : i32
    %c0_i32_0 = arith.constant 0 : i32
    %c0_i32_1 = arith.constant 0 : i32
    return %c0_i32, %c0_i32_0 : i32, i32
  }
  func.func @transform_3(%arg0: i32) -> (i32, i32) {
    %c0_i32 = arith.constant 0 : i32
    %c0_i32_0 = arith.constant 0 : i32
    %c0_i32_1 = arith.constant 0 : i32
    return %c0_i32, %c0_i32_0 : i32, i32
  }
  func.func @transform_4(%arg0: i32) -> (i32, i32) {
    %c0_i32 = arith.constant 0 : i32
    %c0_i32_0 = arith.constant 0 : i32
    %c0_i32_1 = arith.constant 0 : i32
    return %c0_i32, %c0_i32_0 : i32, i32
  }
  func.func @transform_5(%arg0: i32) -> (i32, i32) {
    %c0_i32 = arith.constant 0 : i32
    %c0_i32_0 = arith.constant 0 : i32
    return %arg0, %c0_i32 : i32, i32
  }
}

</mosaic_0001>

<bundles_post_ra>
// kernel: tpu_custom_call.1
= control target key start
LH: loop header
LB: loop body
LE: loop exit
PB: predicated region body
PF: predicated region fallthrough
CT: control target
= control target key end

     0   :  { %10 = vsyncpa [#allocation3], 0  ;;  %s415_s0 = inlined_call_operand.vmem [shape: f32[8,4], index: 0, kind: input, shape index: {}]   ;;  %s416_s1 = inlined_call_operand.vmem [shape: f32[4,128], index: 1, kind: input, shape index: {}]   ;;  %s417_s2 = inlined_call_operand.vmem [shape: f32[1,128], index: 2, kind: input, shape index: {}]   ;;  %s418_s3 = inlined_call_operand.hbm [shape: f32[128,128], index: 3, kind: input, shape index: {}]   ;;  %s419_s4 = inlined_call_operand.vmem [shape: f32[1,128], index: 4, kind: input, shape index: {}]   ;;  %s420_s5 = inlined_call_operand.hbm [shape: f32[8,10], index: 5, kind: output, shape index: {}]  }
   0x1   :  { %11 = vsyncpa [#allocation4], 0  ;;  %s338_s18 = smov [#allocation2]   ;;  %s290_s22 = scalar_lea.hbm %s418_s3, 2048 }
   0x2   :  { %s23_s19 = sshll.u32 %s338_s18, 4  ;;  %p291_p0 = scmp.ne.s32.totalorder %s418_s3, %s290_s22  ;;  %s24_s19 = int_to_ptr.vmem [resolvable:$true] %s23_s19 }
   0x3   :  { %p294_p1 = scmp.lt.u32.totalorder %s290_s22, %s418_s3 }
   0x5   :  { %p296_p2 = pnand %p294_p1, %p291_p0 }
   0x7   :  { %299 = shalt.err (!%p296_p2)
}
   0x8   :  { %s300_s27 = scalar_lea.vmem %s24_s19, 2048  ;;  %p305_p4 = scmp.lt.s32.totalorder %s24_s19, %s24_s19 }
   0x9   :  { %p301_p3 = scmp.ne.s32.totalorder %s24_s19, %s300_s27  ;;  %p306_p5 = scmp.lt.s32.totalorder %s300_s27, %s300_s27 }
   0xb   :  { %p307_p6 = por %p306_p5, %p305_p4 }
   0xd   :  { %p308_p7 = pnand %p307_p6, %p301_p3 }
   0xf   :  { %311 = shalt.err (!%p308_p7)
}
  0x10   :  { %s339_s28 = smov 128   ;;  %s340_s29 = smov 8  }
  0x11   :  { %29 = dma.hbm_to_vmem [thread:$0]  %s418_s3, 2048, %s24_s19, [#allocation3], %s339_s28, %s339_s28, %s340_s29  }
  0x12   :  { %334 = dma.done.wait [#allocation3], 2048  }
  0x13   :  { %335 = vsyncadd [#allocation3], 4294965248  ;;  %v341_v0 = vmov 0   ;;  %v342_v1 = vmov 2   ;;  %v343_v2 = vmov 0.0|0.0   ;;  %v35_v3 = vld [vmem:[%s415_s0] sm:$0xff]  ;;  %v49_v31 = vlaneseq }
  0x14   :  { %285 = vset.pattern.permute.xlu0 %v341_v0  ;;  %287 = vset.pattern.permute.xlu1 %v342_v1  ;;  %v86_v4 = vld [vmem:[#allocation2] sm:$0xff]  ;;  %v87_v5 = vld [vmem:[#allocation2 + $0x8] sm:$0xff]  ;;  %v88_v7 = vld [vmem:[#allocation2 + $0x10] sm:$0xff]  ;;  %v344_v12 = vmov 1   ;;  %v345_v13 = vmov 3   ;;  %vm346_vm0 = vmmov 0  }
  0x15   :  { %250 = vmatprep.subr.bf16.mxu0 %v343_v2  ;;  %46 = vperm.xlu0 %285, %v35_v3   ;;  %v251_v6 = vpack.c.bf16 %v87_v5, %v86_v4  ;;  %v89_v8 = vld [vmem:[#allocation2 + $0x18] sm:$0xff]  ;;  %v90_v10 = vld [vmem:[#allocation2 + $0x20] sm:$0xff]  ;;  %v91_v11 = vld [vmem:[#allocation2 + $0x28] sm:$0xff]  ;;  %v347_v21 = vmov 0.0   ;;  %v50_v32 = vshrl.u32 %v49_v31, 7  ;;  %s348_s12 = smov [#allocation5]  }
  0x16   :  { %66 = vperm.xlu1 %287, %v35_v3   ;;  %v254_v9 = vpack.c.bf16 %v89_v8, %v88_v7  ;;  %v257_v14 = vpack.c.bf16 %v91_v11, %v90_v10  ;;  %v92_v15 = vld [vmem:[#allocation2 + $0x30] sm:$0xff]  ;;  %v93_v16 = vld [vmem:[#allocation2 + $0x38] sm:$0xff]  ;;  %v94_v18 = vld [vmem:[#allocation2 + $0x40] sm:$0xff]  ;;  %247 = vmatprep.mubr.msk.f32.mxu0 %vm346_vm0, %v347_v21  ;;  %s187_s13 = sshll.u32 %s348_s12, 4  ;;  %vm179_vm1 = vcmask 80896   ;;  %s188_s13 = int_to_ptr.vmem [resolvable:$true] %s187_s13 }
  0x17   :  { %252 = vmatpush3.bf16.msra.mxu0 %v251_v6  ;;  %v260_v17 = vpack.c.bf16 %v93_v16, %v92_v15  ;;  %v95_v19 = vld [vmem:[#allocation2 + $0x48] sm:$0xff]  ;;  %v96_v22 = vld [vmem:[#allocation2 + $0x50] sm:$0xff]  ;;  %v97_v23 = vld [vmem:[#allocation2 + $0x58] sm:$0xff]  ;;  %v51_v33 = vsub.s32 0, %v50_v32  ;;  %v61_v36 = vsub.s32 1, %v50_v32  ;;  %v71_v38 = vsub.s32 2, %v50_v32  ;;  %p317_p9 = scmp.lt.s32.totalorder %s188_s13, %s188_s13 }
  0x18   :  { %253 = vmatprep.subr.bf16.mxu0 %v343_v2  ;;  %v263_v20 = vpack.c.bf16 %v95_v19, %v94_v18  ;;  %v266_v24 = vpack.c.bf16 %v97_v23, %v96_v22  ;;  %v98_v25 = vld [vmem:[#allocation2 + $0x60] sm:$0xff]  ;;  %v99_v26 = vld [vmem:[#allocation2 + $0x68] sm:$0xff]  ;;  %v100_v28 = vld [vmem:[#allocation2 + $0x70] sm:$0xff]  ;;  %v81_v40 = vsub.s32 3, %v50_v32 }
  0x19   :  { %286 = vset.pattern.permute.xlu0 %v344_v12  ;;  %v269_v27 = vpack.c.bf16 %v99_v26, %v98_v25  ;;  %v101_v29 = vld [vmem:[#allocation2 + $0x78] sm:$0xff]  ;;  %v36_v34 = vld [vmem:[%s416_s1] sm:$0xf] }
  0x1a   :  { %288 = vset.pattern.permute.xlu1 %v345_v13  ;;  %56 = vperm.xlu0 %286, %v35_v3   ;;  %v272_v30 = vpack.c.bf16 %v101_v29, %v100_v28  ;;  %v52_v35 = vrot.slane %v36_v34, %v51_v33  ;;  %v62_v42 = vrot.slane %v36_v34, %v61_v36  ;;  %v196_v43 = vld [vmem:[%s417_s2] ss:$0 sm:$0xff]  ;;  %s312_s2 = scalar_lea.vmem %s188_s13, 128 }
  0x1b   :  { %76 = vperm.xlu1 %288, %v35_v3   ;;  %255 = vmatpush3.bf16.msra.mxu0 %v254_v9  ;;  %v72_v44 = vrot.slane %v36_v34, %v71_v38  ;;  %v82_v45 = vrot.slane %v36_v34, %v81_v40  ;;  %v197_v56 = vld [vmem:[%s419_s4] ss:$0 sm:$0xff]  ;;  %p313_p8 = scmp.ne.s32.totalorder %s188_s13, %s312_s2  ;;  %p318_p10 = scmp.lt.s32.totalorder %s312_s2, %s312_s2 }
  0x1c   :  { %256 = vmatprep.subr.bf16.mxu0 %v343_v2 }
  0x1d   :  { %p319_p11 = por %p318_p10, %p317_p9 }
  0x1e   :  { %289 = vset.pattern.permute.xlu0 %v345_v13 }
  0x1f   :  { %258 = vmatpush3.bf16.msra.mxu0 %v257_v14  ;;  %p320_p12 = pnand %p319_p11, %p313_p8 }
  0x20   :  { %259 = vmatprep.subr.bf16.mxu0 %v343_v2 }
  0x23   :  { %261 = vmatpush3.bf16.msra.mxu0 %v260_v17 }
  0x24   :  { %262 = vmatprep.subr.bf16.mxu0 %v343_v2 }
  0x27   :  { %264 = vmatpush3.bf16.msra.mxu0 %v263_v20 }
  0x28   :  { %265 = vmatprep.subr.bf16.mxu0 %v343_v2 }
  0x2b   :  { %267 = vmatpush3.bf16.msra.mxu0 %v266_v24 }
  0x2c   :  { %268 = vmatprep.subr.bf16.mxu0 %v343_v2 }
  0x2f   :  { %270 = vmatpush3.bf16.msra.mxu0 %v269_v27 }
  0x30   :  { %271 = vmatprep.subr.bf16.mxu0 %v343_v2 }
  0x33   :  { %273 = vmatpush3.bf16.msra.mxu0 %v272_v30 }
  0x94   :  { %v47_v37 = vpop.permute.xlu0 %46 }
  0x95   :  { %v67_v39 = vpop.permute.xlu1 %66  ;;  %v53_v41 = vmul.f32 %v52_v35, %v47_v37 }
  0x96   :  { %v73_v50 = vmul.f32 %v72_v44, %v67_v39 }
  0x97   :  { %v54_v48 = vadd.f32 %v196_v43, %v53_v41 }
  0x99   :  { %v57_v46 = vpop.permute.xlu0 %56 }
  0x9a   :  { %v77_v47 = vpop.permute.xlu1 %76  ;;  %v63_v49 = vmul.f32 %v62_v42, %v57_v46 }
  0x9b   :  { %v83_v52 = vmul.f32 %v82_v45, %v77_v47 }
  0x9c   :  { %v64_v51 = vadd.f32 %v63_v49, %v54_v48 }
  0x9e   :  { %v74_v53 = vadd.f32 %v73_v50, %v64_v51 }
  0xa0   :  { %v84_v54 = vadd.f32 %v83_v52, %v74_v53 }
  0xa2   :  { %v85_v55 = vmax.f32 %v84_v54, 0.0 }
  0xa4   :  { %248 = vmatmul.mubr.f32.vlgmr.msra.gmra.mrb[0].mxu0 %v85_v55 }
 0x177   :  { %v175_v57 = vpop.f32.mrb[0].mxu0 }
 0x178   :  { %v176_v58 = vadd.f32 %v197_v56, %v175_v57  ;;  %v249_v59 = vpop.f32.mrb[1].mxu0 }
 0x17a   :  { %180 = vst.msk [vmem:[#allocation5] sm:$0xff] %vm179_vm1, %v176_v58 }
 0x17b   :  { %323 = shalt.err (!%p320_p12)
}
 0x17c   :  { %s324_s16 = scalar_lea.hbm %s420_s5, 128 }
 0x17d   :  { %p325_p13 = scmp.ne.s32.totalorder %s420_s5, %s324_s16  ;;  %p328_p0 = scmp.lt.u32.totalorder %s324_s16, %s420_s5 }
 0x17f   :  { %p330_p1 = pnand %p328_p0, %p325_p13 }
 0x181   :  { %333 = shalt.err (!%p330_p1)
}
 0x182   :  { %190 = dma.vmem_to_hbm [thread:$0]  %s188_s13, 128, %s420_s5, [#allocation4]  }
 0x183   :  { %336 = dma.done.wait [#allocation4], 128  }
 0x184   :  { %337 = vsyncadd [#allocation4], 4294967168 }
 0x185   :  { %194 = vsyncpa [#allocation3], 1 }
 0x186   :  { %195 = vsyncpa [#allocation4], 1 }

</bundles_post_ra>
